<compile_context>
chip_gen: v7x
topology: tpu7x:2x2x1
jax: 0.10.0
libtpu: 0.0.40
codegen_flags: <defaults>
</compile_context>

<pallas_src>
import jax
import jax.numpy as jnp
from jax import lax
from jax.experimental import pallas as pl
from jax.experimental.pallas import tpu as pltpu


def _round_up(x, m):
    return (x + m - 1) // m * m


def _pick_tn(out_dim, target=512):
    """Largest multiple-of-128 divisor of out_dim that is <= target (else full width)."""
    if out_dim <= target or out_dim % 128 != 0:
        return out_dim
    for cand in range(target, 127, -128):
        if out_dim % cand == 0:
            return cand
    return out_dim


# ---------------------------------------------------------------------------
# Projection path kernel: grid = (row_tiles, out_dim_tiles)
# ---------------------------------------------------------------------------
def _prefix_proj_kernel(idx_ref,   # VMEM (tm, 1) int32   flat (B*T) prefix ids, this row tile
                        emb_ref,   # VMEM (T_vocab, token_dim)   grid-invariant
                        w1_ref,    # VMEM (token_dim, hidden)    grid-invariant
                        b1_ref,    # VMEM (1, hidden)            grid-invariant
                        w2_ref,    # VMEM (hidden, tn)           streamed per N tile
                        b2_ref,    # VMEM (1, tn)                streamed per N tile
                        o_ref,     # VMEM (tm, tn)
                        h_ref):    # VMEM scratch (tm, hidden) f32 -- layer-1 cache
    n = pl.program_id(1)

    # Layer 1 (gather + Linear + tanh) only once per row tile; cached across N tiles.
    @pl.when(n == 0)
    def _():
        tm = idx_ref.shape[0]
        t_vocab = emb_ref.shape[0]
        # Vectorized embedding gather as a one-hot matmul on the MXU:
        #   x[r, :] = emb[idx[r], :]
        one_hot = (idx_ref[...] ==
                   lax.broadcasted_iota(jnp.int32, (tm, t_vocab), 1)
                   ).astype(jnp.float32)                        # (tm, T_vocab)
        x = jnp.dot(one_hot, emb_ref[...],
                    preferred_element_type=jnp.float32)         # (tm, token_dim)
        h_ref[...] = jnp.tanh(
            jnp.dot(x, w1_ref[...], preferred_element_type=jnp.float32)
            + b1_ref[...])

    # Layer 2 for this output-column tile.
    o_ref[...] = (jnp.dot(h_ref[...], w2_ref[...],
                          preferred_element_type=jnp.float32)
                  + b2_ref[...]).astype(o_ref.dtype)


# ---------------------------------------------------------------------------
# No-projection path kernel: pipelined HBM row gather driven by the index_map.
# ---------------------------------------------------------------------------
def _prefix_embed_kernel(idx_ref, emb_ref, o_ref):
    del idx_ref  # consumed by the BlockSpec index_map
    o_ref[...] = emb_ref[...]


# ---------------------------------------------------------------------------
# Wrappers
# ---------------------------------------------------------------------------
def prefix_encoder_forward(prefix, params, *, prefix_projection):
    """Pallas implementation of PrefixEncoder.forward.

    prefix: int array (batch, num_virtual_tokens)
    returns: float32 array (batch, num_virtual_tokens, 2 * num_layers * token_dim)
    """
    prefix = prefix.astype(jnp.int32)
    batch, num_tokens = prefix.shape

    if prefix_projection:
        emb = params["embedding"].astype(jnp.float32)          # (T_vocab, token_dim)
        w1 = params["w1"].astype(jnp.float32)                  # (token_dim, hidden)
        b1 = params["b1"].reshape(1, -1).astype(jnp.float32)   # (1, hidden)
        w2 = params["w2"].astype(jnp.float32)                  # (hidden, out_dim)
        b2 = params["b2"].reshape(1, -1).astype(jnp.float32)   # (1, out_dim)
        t_vocab, token_dim = emb.shape
        hidden = w1.shape[1]
        out_dim = w2.shape[1]

        # Clamp ids: VMEM reads have no runtime bounds check on TPU.
        prefix = jnp.clip(prefix, 0, t_vocab - 1)

        # Flatten batch into the matmul M dimension, tile rows and out_dim.
        rows = batch * num_tokens
        tm = min(256, _round_up(rows, 8))          # row tile (M); 256 fills the MXU
        padded_rows = _round_up(rows, tm)
        num_row_tiles = padded_rows // tm
        tn = _pick_tn(out_dim)                     # output-column tile (N)
        num_n_tiles = out_dim // tn

        flat_ids = prefix.reshape(-1)
        if padded_rows != rows:
            flat_ids = jnp.pad(flat_ids, (0, padded_rows - rows))
        ids2d = flat_ids.reshape(padded_rows, 1)

        cost = pl.CostEstimate(
            flops=2 * padded_rows * (t_vocab * token_dim
                                     + token_dim * hidden
                                     + hidden * out_dim),
            transcendentals=padded_rows * hidden,
            bytes_accessed=4 * (padded_rows
                                + t_vocab * token_dim
                                + token_dim * hidden + hidden
                                + hidden * out_dim + out_dim
                                + padded_rows * out_dim),
        )

        out_flat = pl.pallas_call(
            _prefix_proj_kernel,
            out_shape=jax.ShapeDtypeStruct((padded_rows, out_dim), jnp.float32),
            grid_spec=pltpu.PrefetchScalarGridSpec(
                num_scalar_prefetch=0,
                grid=(num_row_tiles, num_n_tiles),
                in_specs=[
                    pl.BlockSpec((tm, 1), lambda r, n: (r, 0)),          # ids
                    pl.BlockSpec(emb.shape, lambda r, n: (0, 0)),        # emb (resident)
                    pl.BlockSpec(w1.shape, lambda r, n: (0, 0)),         # w1  (resident)
                    pl.BlockSpec(b1.shape, lambda r, n: (0, 0)),         # b1  (resident)
                    pl.BlockSpec((hidden, tn), lambda r, n: (0, n)),     # w2  (N tile)
                    pl.BlockSpec((1, tn), lambda r, n: (0, n)),          # b2  (N tile)
                ],
                out_specs=pl.BlockSpec((tm, tn), lambda r, n: (r, n)),
                scratch_shapes=[pltpu.VMEM((tm, hidden), jnp.float32)],
            ),
            compiler_params=pltpu.CompilerParams(
                # rows independent -> parallel (2 TCs on v7x); N axis carries the
                # layer-1 cache -> arbitrary (sequential).
                dimension_semantics=("parallel", "arbitrary"),
                vmem_limit_bytes=32 * 1024 * 1024),
            cost_estimate=cost,
        )(ids2d, emb, w1, b1, w2, b2)

        return out_flat[:rows].reshape(batch, num_tokens, out_dim)

    else:
        emb = params["embedding"].astype(jnp.float32)          # (T_vocab, out_dim)
        t_vocab, out_dim = emb.shape
        prefix = jnp.clip(prefix, 0, t_vocab - 1)

        flat_ids = prefix.reshape(-1)                          # (B*T,) scalar-prefetched
        emb3 = emb.reshape(t_vocab, 1, out_dim)                # rows as (1, out_dim) blocks

        cost = pl.CostEstimate(
            flops=0,
            transcendentals=0,
            bytes_accessed=4 * (batch * num_tokens
                                + 2 * batch * num_tokens * out_dim),
        )

        out = pl.pallas_call(
            _prefix_embed_kernel,
            out_shape=jax.ShapeDtypeStruct((batch * num_tokens, 1, out_dim),
                                           jnp.float32),
            grid_spec=pltpu.PrefetchScalarGridSpec(
                num_scalar_prefetch=1,
                grid=(batch * num_tokens,),
                in_specs=[
                    # Gather driven by the index_map: one table row DMA per step.
                    pl.BlockSpec((1, 1, out_dim), lambda g, idx: (idx[g], 0, 0)),
                ],
                out_specs=pl.BlockSpec((1, 1, out_dim), lambda g, idx: (g, 0, 0)),
            ),
            compiler_params=pltpu.CompilerParams(
                dimension_semantics=("parallel",),
                vmem_limit_bytes=32 * 1024 * 1024),
            cost_estimate=cost,
        )(flat_ids, emb3)

        return out.reshape(batch, num_tokens, out_dim)


# ---------------------------------------------------------------------------
# Deterministic parameter construction + reference + demo
# ---------------------------------------------------------------------------
def make_params(key, *, num_virtual_tokens, token_dim, num_layers,
                encoder_hidden_size, prefix_projection):
    out_dim = num_layers * 2 * token_dim
    ks = jax.random.split(key, 5)
    if prefix_projection:
        return {
            "embedding": 0.1 * jax.random.normal(
                ks[0], (num_virtual_tokens, token_dim), jnp.float32),
            "w1": 0.05 * jax.random.normal(
                ks[1], (token_dim, encoder_hidden_size), jnp.float32),
            "b1": 0.01 * jax.random.normal(
                ks[2], (encoder_hidden_size,), jnp.float32),
            "w2": 0.05 * jax.random.normal(
                ks[3], (encoder_hidden_size, out_dim), jnp.float32),
            "b2": 0.01 * jax.random.normal(ks[4], (out_dim,), jnp.float32),
        }
    else:
        return {
            "embedding": 0.1 * jax.random.normal(
                ks[0], (num_virtual_tokens, out_dim), jnp.float32),
        }


def reference_forward(prefix, params, *, prefix_projection):
    if prefix_projection:
        x = params["embedding"][prefix]                       # (B, T, token_dim)
        h = jnp.tanh(x @ params["w1"] + params["b1"])
        return h @ params["w2"] + params["b2"]
    return params["embedding"][prefix]


if __name__ == "__main__":
    # Small config consistent with PrefixTuningConfig
    batch = 2
    num_virtual_tokens = 8
    token_dim = 32
    num_layers = 2
    encoder_hidden_size = 64

    key = jax.random.PRNGKey(0)
    k_idx, k_p1, k_p2 = jax.random.split(key, 3)

    # prefix ids: (batch, num_virtual_tokens)
    prefix = jnp.tile(jnp.arange(num_virtual_tokens, dtype=jnp.int32)[None, :],
                      (batch, 1))
    # permute rows deterministically so the gather is non-trivial
    prefix = jax.random.permutation(k_idx, prefix, axis=1, independent=True)

    # ---- prefix_projection = True path (gather + 2-layer MLP in-kernel) ----
    params_proj = make_params(k_p1,
                              num_virtual_tokens=num_virtual_tokens,
                              token_dim=token_dim, num_layers=num_layers,
                              encoder_hidden_size=encoder_hidden_size,
                              prefix_projection=True)
    out_proj = prefix_encoder_forward(prefix, params_proj, prefix_projection=True)
    out_proj = jax.block_until_ready(out_proj)
    ref_proj = reference_forward(prefix, params_proj, prefix_projection=True)
    assert out_proj.shape == (batch, num_virtual_tokens, 2 * num_layers * token_dim)
    assert jnp.allclose(out_proj, ref_proj, atol=1e-3, rtol=1e-3)

    # ---- prefix_projection = False path (index_map-driven row gather) ----
    params_emb = make_params(k_p2,
                             num_virtual_tokens=num_virtual_tokens,
                             token_dim=token_dim, num_layers=num_layers,
                             encoder_hidden_size=encoder_hidden_size,
                             prefix_projection=False)
    out_emb = prefix_encoder_forward(prefix, params_emb, prefix_projection=False)
    out_emb = jax.block_until_ready(out_emb)
    ref_emb = reference_forward(prefix, params_emb, prefix_projection=False)
    assert out_emb.shape == (batch, num_virtual_tokens, 2 * num_layers * token_dim)
    assert jnp.allclose(out_emb, ref_emb, atol=1e-5, rtol=1e-5)

    print("KERNEL_OK")
</pallas_src>

<mosaic_0001>
module attributes {stable_mosaic.version = 11 : i64} {
  func.func @_prefix_proj_kernel(%arg0: i32, %arg1: i32, %arg2: memref<16x1xi32, #tpu.memory_space<vmem>>, %arg3: memref<8x32xf32, #tpu.memory_space<vmem>>, %arg4: memref<32x64xf32, #tpu.memory_space<vmem>>, %arg5: memref<1x64xf32, #tpu.memory_space<vmem>>, %arg6: memref<64x128xf32, #tpu.memory_space<vmem>>, %arg7: memref<1x128xf32, #tpu.memory_space<vmem>>, %arg8: memref<16x128xf32, #tpu.memory_space<vmem>>, %arg9: memref<16x64xf32, #tpu.memory_space<vmem>>) attributes {dimension_semantics = [#tpu.dimension_semantics<parallel>, #tpu.dimension_semantics<arbitrary>], iteration_bounds = array<i64: 1, 1>, scalar_prefetch = 0 : i64, scratch_operands = 1 : i64, tpu.core_type = #tpu.core_type<tc>, window_params = [{transform_indices = @transform_0, window_bounds = array<i64: 16, 1>}, {pipeline_mode = #tpu.pipeline_mode<synchronous>, transform_indices = @transform_1, window_bounds = array<i64: 8, 32>}, {pipeline_mode = #tpu.pipeline_mode<synchronous>, transform_indices = @transform_2, window_bounds = array<i64: 32, 64>}, {pipeline_mode = #tpu.pipeline_mode<synchronous>, transform_indices = @transform_3, window_bounds = array<i64: 1, 64>}, {transform_indices = @transform_4, window_bounds = array<i64: 64, 128>}, {transform_indices = @transform_5, window_bounds = array<i64: 1, 128>}, {transform_indices = @transform_6, window_bounds = array<i64: 16, 128>}]} {
    %c0_i32 = arith.constant 0 : i32
    %0 = arith.cmpi eq, %arg1, %c0_i32 : i32
    %1 = arith.extui %0 : i1 to i32
    %c0_i32_0 = arith.constant 0 : i32
    %2 = arith.cmpi ne, %1, %c0_i32_0 : i32
    scf.if %2 {
      %c0_8 = arith.constant 0 : index
      %c0_9 = arith.constant 0 : index
      %10 = vector.load %arg2[%c0_8, %c0_9] : memref<16x1xi32, #tpu.memory_space<vmem>>, vector<16x1xi32>
      %11 = tpu.iota {dimensions = array<i32: 1>} : vector<16x8xi32>
      %12 = vector.broadcast %10 : vector<16x1xi32> to vector<16x8xi32>
      %13 = arith.cmpi eq, %12, %11 : vector<16x8xi32>
      %14 = arith.extui %13 : vector<16x8xi1> to vector<16x8xi32>
      %15 = arith.sitofp %14 : vector<16x8xi32> to vector<16x8xf32>
      %c0_10 = arith.constant 0 : index
      %c0_11 = arith.constant 0 : index
      %16 = vector.load %arg3[%c0_10, %c0_11] : memref<8x32xf32, #tpu.memory_space<vmem>>, vector<8x32xf32>
      %cst_12 = arith.constant dense<0.000000e+00> : vector<16x32xf32>
      %17 = tpu.matmul %15, %16, %cst_12 {dimension_numbers = #tpu.dot_dimension_numbers<[1], [0], [0], [1], [0, 0, 1, 1], [], []>} : vector<16x8xf32>, vector<8x32xf32>, vector<16x32xf32> -> vector<16x32xf32>
      %c0_13 = arith.constant 0 : index
      %c0_14 = arith.constant 0 : index
      %18 = vector.load %arg4[%c0_13, %c0_14] : memref<32x64xf32, #tpu.memory_space<vmem>>, vector<32x64xf32>
      %cst_15 = arith.constant dense<0.000000e+00> : vector<16x64xf32>
      %19 = tpu.matmul %17, %18, %cst_15 {dimension_numbers = #tpu.dot_dimension_numbers<[1], [0], [0], [1], [0, 0, 1, 1], [], []>} : vector<16x32xf32>, vector<32x64xf32>, vector<16x64xf32> -> vector<16x64xf32>
      %c0_16 = arith.constant 0 : index
      %c0_17 = arith.constant 0 : index
      %20 = vector.load %arg5[%c0_16, %c0_17] : memref<1x64xf32, #tpu.memory_space<vmem>>, vector<1x64xf32>
      %21 = vector.broadcast %20 : vector<1x64xf32> to vector<16x64xf32>
      %22 = arith.addf %19, %21 : vector<16x64xf32>
      %23 = math.tanh %22 : vector<16x64xf32>
      %c0_18 = arith.constant 0 : index
      %c0_19 = arith.constant 0 : index
      %24 = vector.load %arg9[%c0_18, %c0_19] : memref<16x64xf32, #tpu.memory_space<vmem>>, vector<16x64xf32>
      tpu.vector_store %arg9[%c0_18, %c0_19], %23 {strides = array<i32>} : memref<16x64xf32, #tpu.memory_space<vmem>>, vector<16x64xf32>,
    } else {
    }
    %c0 = arith.constant 0 : index
    %c0_1 = arith.constant 0 : index
    %3 = vector.load %arg9[%c0, %c0_1] : memref<16x64xf32, #tpu.memory_space<vmem>>, vector<16x64xf32>
    %c0_2 = arith.constant 0 : index
    %c0_3 = arith.constant 0 : index
    %4 = vector.load %arg6[%c0_2, %c0_3] : memref<64x128xf32, #tpu.memory_space<vmem>>, vector<64x128xf32>
    %cst = arith.constant dense<0.000000e+00> : vector<16x128xf32>
    %5 = tpu.matmul %3, %4, %cst {dimension_numbers = #tpu.dot_dimension_numbers<[1], [0], [0], [1], [0, 0, 1, 1], [], []>} : vector<16x64xf32>, vector<64x128xf32>, vector<16x128xf32> -> vector<16x128xf32>
    %c0_4 = arith.constant 0 : index
    %c0_5 = arith.constant 0 : index
    %6 = vector.load %arg7[%c0_4, %c0_5] : memref<1x128xf32, #tpu.memory_space<vmem>>, vector<1x128xf32>
    %7 = vector.broadcast %6 : vector<1x128xf32> to vector<16x128xf32>
    %8 = arith.addf %5, %7 : vector<16x128xf32>
    %c0_6 = arith.constant 0 : index
    %c0_7 = arith.constant 0 : index
    %9 = vector.load %arg8[%c0_6, %c0_7] : memref<16x128xf32, #tpu.memory_space<vmem>>, vector<16x128xf32>
    tpu.vector_store %arg8[%c0_6, %c0_7], %8 {strides = array<i32>} : memref<16x128xf32, #tpu.memory_space<vmem>>, vector<16x128xf32>,
    return
  }
  func.func @transform_0(%arg0: i32, %arg1: i32) -> (i32, i32) {
    %c0_i32 = arith.constant 0 : i32
    %c0_i32_0 = arith.constant 0 : i32
    return %arg0, %c0_i32 : i32, i32
  }
  func.func @transform_1(%arg0: i32, %arg1: i32) -> (i32, i32) {
    %c0_i32 = arith.constant 0 : i32
    %c0_i32_0 = arith.constant 0 : i32
    %c0_i32_1 = arith.constant 0 : i32
    return %c0_i32, %c0_i32_0 : i32, i32
  }
  func.func @transform_2(%arg0: i32, %arg1: i32) -> (i32, i32) {
    %c0_i32 = arith.constant 0 : i32
    %c0_i32_0 = arith.constant 0 : i32
    %c0_i32_1 = arith.constant 0 : i32
    return %c0_i32, %c0_i32_0 : i32, i32
  }
  func.func @transform_3(%arg0: i32, %arg1: i32) -> (i32, i32) {
    %c0_i32 = arith.constant 0 : i32
    %c0_i32_0 = arith.constant 0 : i32
    %c0_i32_1 = arith.constant 0 : i32
    return %c0_i32, %c0_i32_0 : i32, i32
  }
  func.func @transform_4(%arg0: i32, %arg1: i32) -> (i32, i32) {
    %c0_i32 = arith.constant 0 : i32
    %c0_i32_0 = arith.constant 0 : i32
    return %c0_i32, %arg1 : i32, i32
  }
  func.func @transform_5(%arg0: i32, %arg1: i32) -> (i32, i32) {
    %c0_i32 = arith.constant 0 : i32
    %c0_i32_0 = arith.constant 0 : i32
    return %c0_i32, %arg1 : i32, i32
  }
  func.func @transform_6(%arg0: i32, %arg1: i32) -> (i32, i32) {
    %c0_i32 = arith.constant 0 : i32
    return %arg0, %arg1 : i32, i32
  }
}

</mosaic_0001>

<bundles_post_ra>
// kernel: tpu_custom_call.1
= control target key start
LH: loop header
LB: loop body
LE: loop exit
PB: predicated region body
PF: predicated region fallthrough
CT: control target
= control target key end

     0   :  { %11 = vsyncpa [#allocation4], 0  ;;  %s646_s0 = inlined_call_operand.vmem [shape: s32[16,1], index: 0, kind: input, shape index: {}]   ;;  %s647_s1 = inlined_call_operand.vmem [shape: f32[8,32], index: 1, kind: input, shape index: {}]   ;;  %s648_s2 = inlined_call_operand.hbm [shape: f32[32,64], index: 2, kind: input, shape index: {}]   ;;  %s649_s3 = inlined_call_operand.vmem [shape: f32[1,64], index: 3, kind: input, shape index: {}]   ;;  %s650_s4 = inlined_call_operand.hbm [shape: f32[64,128], index: 4, kind: input, shape index: {}]   ;;  %s651_s5 = inlined_call_operand.vmem [shape: f32[1,128], index: 5, kind: input, shape index: {}]   ;;  %s652_s6 = inlined_call_operand.hbm [shape: f32[16,128], index: 6, kind: output, shape index: {}]  }
   0x1   :  { %12 = vsyncpa [#allocation7], 0 }
   0x2   :  { %13 = vsyncpa [#allocation5], 0  ;;  %s544_s21 = smov [#allocation3]   ;;  %s472_s25 = scalar_lea.hbm %s648_s2, 512 }
   0x3   :  { %s23_s22 = sshll.u32 %s544_s21, 4  ;;  %p473_p0 = scmp.ne.s32.totalorder %s648_s2, %s472_s25  ;;  %s24_s22 = int_to_ptr.vmem [resolvable:$true] %s23_s22 }
   0x4   :  { %p476_p1 = scmp.lt.u32.totalorder %s472_s25, %s648_s2 }
   0x6   :  { %p478_p2 = pnand %p476_p1, %p473_p0 }
   0x8   :  { %481 = shalt.err (!%p478_p2)
}
   0x9   :  { %s482_s30 = scalar_lea.vmem %s24_s22, 512  ;;  %p487_p4 = scmp.lt.s32.totalorder %s24_s22, %s24_s22 }
   0xa   :  { %p483_p3 = scmp.ne.s32.totalorder %s24_s22, %s482_s30  ;;  %p488_p5 = scmp.lt.s32.totalorder %s482_s30, %s482_s30 }
   0xc   :  { %p489_p6 = por %p488_p5, %p487_p4 }
   0xe   :  { %p490_p7 = pnand %p489_p6, %p483_p3 }
  0x10   :  { %493 = shalt.err (!%p490_p7)
}
  0x11   :  { %s545_s7 = smov 128   ;;  %s546_s8 = smov 8  }
  0x12   :  { %29 = dma.hbm_to_vmem [thread:$0]  %s648_s2, 512, %s24_s22, [#allocation4], %s545_s7, %s545_s7, %s546_s8  }
  0x13   :  { %s547_s11 = smov [#allocation6]   ;;  %s494_s15 = scalar_lea.hbm %s650_s4, 1024 }
  0x14   :  { %s37_s12 = sshll.u32 %s547_s11, 4  ;;  %p495_p8 = scmp.ne.s32.totalorder %s650_s4, %s494_s15  ;;  %s38_s12 = int_to_ptr.vmem [resolvable:$true] %s37_s12 }
  0x15   :  { %p498_p9 = scmp.lt.u32.totalorder %s494_s15, %s650_s4 }
  0x17   :  { %p500_p10 = pnand %p498_p9, %p495_p8 }
  0x19   :  { %503 = shalt.err (!%p500_p10)
}
  0x1a   :  { %s504_s20 = scalar_lea.vmem %s38_s12, 1024  ;;  %p509_p12 = scmp.lt.s32.totalorder %s38_s12, %s38_s12 }
  0x1b   :  { %p505_p11 = scmp.ne.s32.totalorder %s38_s12, %s504_s20  ;;  %p510_p13 = scmp.lt.s32.totalorder %s504_s20, %s504_s20 }
  0x1d   :  { %p511_p0 = por %p510_p13, %p509_p12 }
  0x1f   :  { %p512_p1 = pnand %p511_p0, %p505_p11 }
  0x21   :  { %515 = shalt.err (!%p512_p1)
}
  0x22   :  { %43 = dma.hbm_to_vmem [thread:$0]  %s650_s4, 1024, %s38_s12, [#allocation7], %s545_s7, %s545_s7, %s546_s8  }
  0x23   :  { %538 = dma.done.wait [#allocation4], 512  }
  0x24   :  { %539 = vsyncadd [#allocation4], 4294966784 }
  0x25   :  { %540 = dma.done.wait [#allocation7], 1024  }
  0x26   :  { %541 = vsyncadd [#allocation7], 4294966272  ;;  %v548_v0 = vmov 0   ;;  %v56_v1 = vld [vmem:[%s646_s0] sm:$0xff]  ;;  %v57_v2 = vld [vmem:[%s646_s0 + $0x8] sm:$0xff]  ;;  %v58_v7 = vlaneseq  ;;  %vm73_vm0 = vcmask 64512  }
  0x27   :  { %467 = vset.pattern.permute.xlu0 %v548_v0  ;;  %v72_v3 = vld [vmem:[%s647_s1] sm:$0xff]  ;;  %v155_v4 = vld [vmem:[#allocation3] sm:$0xff]  ;;  %v156_v5 = vld [vmem:[#allocation3 + $0x8] sm:$0xff]  ;;  %v549_v10 = vmov 0.0   ;;  %vm166_vm3 = vcmask 261120   ;;  %vm250_vm4 = vcmask 523264  }
  0x28   :  { %61 = vperm.xlu0 %467, %v56_v1   ;;  %401 = vmatprep.subr.mxu1 %v72_v3  ;;  %v436_v6 = vpack.c.bf16 %v156_v5, %v155_v4  ;;  %v59_v8 = vand.u32 127, %v58_v7  ;;  %v157_v12 = vld [vmem:[#allocation3 + $0x10] sm:$0xff]  ;;  %v158_v13 = vld [vmem:[#allocation3 + $0x18] sm:$0xff]  ;;  %v255_v19 = vld [vmem:[#allocation6] sm:$0xff] }
  0x29   :  { %402 = vmatpush3.msra.mxu1 %v72_v3  ;;  %v440_v15 = vpack.c.bf16 %v158_v13, %v157_v12  ;;  %v256_v20 = vld [vmem:[#allocation6 + $0x8] sm:$0xff]  ;;  %v257_v21 = vld [vmem:[#allocation6 + $0x10] sm:$0xff]  ;;  %v258_v23 = vld [vmem:[#allocation6 + $0x18] sm:$0xff] }
  0x2a   :  { %437 = vmatprep.subr.bf16.mxu1 %v436_v6  ;;  %v444_v22 = vpack.c.bf16 %v256_v20, %v255_v19  ;;  %v448_v24 = vpack.c.bf16 %v258_v23, %v257_v21  ;;  %v259_v25 = vld [vmem:[#allocation6 + $0x20] sm:$0xff]  ;;  %v260_v26 = vld [vmem:[#allocation6 + $0x28] sm:$0xff]  ;;  %v261_v28 = vld [vmem:[#allocation6 + $0x30] sm:$0xff] }
  0x2b   :  { %v452_v27 = vpack.c.bf16 %v260_v26, %v259_v25  ;;  %v262_v29 = vld [vmem:[#allocation6 + $0x38] sm:$0xff]  ;;  %v376_v31 = vld [vmem:[%s649_s3] ss:$0 sm:$0xff]  ;;  %s550_s3 = smov [#allocation8]  }
  0x2c   :  { %64 = vperm.xlu0 %467, %v57_v2   ;;  %445 = vmatprep.subr.bf16.mxu0 %v444_v22  ;;  %v456_v30 = vpack.c.bf16 %v262_v29, %v261_v28  ;;  %v379_v40 = vld [vmem:[%s651_s5] ss:$0 sm:$0xff]  ;;  %s359_s29 = sshll.u32 %s550_s3, 4  ;;  %s360_s29 = int_to_ptr.vmem [resolvable:$true] %s359_s29 }
  0x2d   :  { %447 = vmatpush3.bf16.msra.mxu0 %v444_v22  ;;  %s516_s30 = scalar_lea.vmem %s360_s29, 256  ;;  %p521_p3 = scmp.lt.s32.totalorder %s360_s29, %s360_s29 }
  0x2e   :  { %449 = vmatprep.subr.bf16.mxu0 %v448_v24  ;;  %p517_p2 = scmp.ne.s32.totalorder %s360_s29, %s516_s30  ;;  %p522_p4 = scmp.lt.s32.totalorder %s516_s30, %s516_s30 }
  0x30   :  { %p523_p5 = por %p522_p4, %p521_p3 }
  0x31   :  { %451 = vmatpush3.bf16.msra.mxu0 %v448_v24 }
  0x32   :  { %453 = vmatprep.subr.bf16.mxu0 %v452_v27  ;;  %p524_p6 = pnand %p523_p5, %p517_p2 }
  0x35   :  { %455 = vmatpush3.bf16.msra.mxu0 %v452_v27 }
  0x36   :  { %457 = vmatprep.subr.bf16.mxu0 %v456_v30 }
  0x39   :  { %459 = vmatpush3.bf16.msra.mxu0 %v456_v30 }
  0xa7   :  { %v62_v9 = vpop.permute.xlu0 %61 }
  0xa8   :  { %vm66_vm1 = vcmp.eq.s32.totalorder %v62_v9, %v59_v8 }
  0xa9   :  { %v372_v11 = vsel %vm66_vm1, 1.0, %v549_v10 }
  0xaa   :  { %403 = vmatprep.mubr.msk.f32.mxu1 %vm73_vm0, %v372_v11 }
  0xab   :  { %v65_v14 = vpop.permute.xlu0 %64 }
  0xac   :  { %vm67_vm2 = vcmp.eq.s32.totalorder %v65_v14, %v59_v8 }
  0xad   :  { %v373_v16 = vsel %vm67_vm2, 1.0, %v549_v10 }
  0xae   :  { %404 = vmatmul.mubr.msk.f32.vlgmr.msra.gmra.mrb[0].mxu1 %vm73_vm0, %v373_v16 }
  0xaf   :  { %439 = vmatpush3.bf16.msra.mxu1 %v436_v6 }
  0xb0   :  { %441 = vmatprep.subr.bf16.mxu1 %v440_v15 }
  0xb3   :  { %443 = vmatpush3.bf16.msra.mxu1 %v440_v15 }
 0x181   :  { %v405_v17 = vpop.f32.mrb[0].mxu1 }
 0x182   :  { %v146_v18 = vpop.f32.mrb[1].mxu1 }
 0x183   :  { %414 = vmatprep.mubr.msk.f32.mxu1 %vm166_vm3, %v146_v18 }
 0x184   :  { %415 = vmatmul.mubr.msk.f32.vlgmr.msra.gmra.mrb[2].mxu1 %vm166_vm3, %v405_v17 }
 0x257   :  { %v416_v32 = vpop.f32.mrb[2].mxu1 }
 0x258   :  { %v245_v33 = vadd.f32 %v416_v32, %v376_v31  ;;  %v239_v34 = vpop.f32.mrb[3].mxu1 }
 0x259   :  { %v240_v35 = vadd.f32 %v376_v31, %v239_v34 }
 0x25a   :  { %468 = vtanh.f32 %v245_v33 }
 0x25b   :  { %470 = vtanh.f32 %v240_v35 }
 0x264   :  { %v469_v36 = vpop.eup %468 }
 0x265   :  { %v471_v37 = vpop.eup %470  ;;  %252 = vst.msk [vmem:[#allocation2 + $0x8] sm:$0xff] %vm250_vm4, %v469_v36 }
 0x266   :  { %251 = vst.msk [vmem:[#allocation2] sm:$0xff] %vm250_vm4, %v471_v37 }
 0x26c   :  { %v254_v39 = vld [vmem:[#allocation2 + $0x8] sm:$0xff] }
 0x26d   :  { %v253_v38 = vld [vmem:[#allocation2] sm:$0xff] }
 0x26e   :  { %433 = vmatprep.mubr.msk.f32.mxu0 %vm250_vm4, %v253_v38 }
 0x26f   :  { %434 = vmatmul.mubr.msk.f32.vlgmr.msra.gmra.mrb[0].mxu0 %vm250_vm4, %v254_v39 }
 0x342   :  { %v435_v41 = vpop.f32.mrb[0].mxu0 }
 0x343   :  { %v349_v42 = vadd.f32 %v435_v41, %v379_v40  ;;  %v343_v43 = vpop.f32.mrb[1].mxu0 }
 0x344   :  { %v344_v44 = vadd.f32 %v379_v40, %v343_v43 }
 0x345   :  { %353 = vst [vmem:[#allocation8 + $0x8] sm:$0xff] %v349_v42 }
 0x346   :  { %352 = vst [vmem:[#allocation8] sm:$0xff] %v344_v44 }
 0x347   :  { %527 = shalt.err (!%p524_p6)
}
 0x348   :  { %s528_s5 = scalar_lea.hbm %s652_s6, 256 }
 0x349   :  { %p529_p7 = scmp.ne.s32.totalorder %s652_s6, %s528_s5  ;;  %p532_p8 = scmp.lt.u32.totalorder %s528_s5, %s652_s6 }
 0x34b   :  { %p534_p9 = pnand %p532_p8, %p529_p7 }
 0x34d   :  { %537 = shalt.err (!%p534_p9)
}
 0x34e   :  { %365 = dma.vmem_to_hbm [thread:$0]  %s360_s29, 256, %s652_s6, [#allocation5], %s545_s7, %s545_s7, %s546_s8  }
 0x34f   :  { %542 = dma.done.wait [#allocation5], 256  }
 0x350   :  { %543 = vsyncadd [#allocation5], 4294967040 }
 0x351   :  { %369 = vsyncpa [#allocation4], 1 }
 0x352   :  { %370 = vsyncpa [#allocation7], 1 }
 0x353   :  { %371 = vsyncpa [#allocation5], 1 }

</bundles_post_ra>
